<compile_context>
chip_gen: v7x
topology: tpu7x:2x2x1
jax: 0.10.0
libtpu: 0.0.40
codegen_flags: <defaults>
</compile_context>

<pallas_src>
import functools

import jax
import jax.numpy as jnp
from jax.experimental import pallas as pl
from jax.experimental.pallas import tpu as pltpu

IN_DIM = 104
HID_DIM = 35
OUT_DIM = 1
_LANES = 128


def _sigmoid_tanh(z):
    # sigmoid(z) == 0.5 * tanh(0.5 * z) + 0.5 : one EUP push (tanh) instead of
    # exp + reciprocal; the mul/adds are VPU-slot filler.
    return 0.5 * jnp.tanh(0.5 * z) + 0.5


def _passing_net_kernel(x_ref, w1_ref, b1_ref, w2_ref, b2_ref, o_ref, *,
                        epilogue_dtype):
    nr, nl = o_ref.shape                       # (bt // 128, 128)

    # x arrives from HBM as f32 (dominant stream, no extra wrapper pass);
    # cast to bf16 here so layer 1 uses the native bf16 MXU path.
    x = x_ref[...].astype(jnp.bfloat16)        # (bt, 104) bf16
    w1 = w1_ref[...]                           # (104, 35) bf16, VMEM-resident

    # Layer 1: MXU matmul with f32 accumulation.
    z1 = jnp.dot(x, w1, preferred_element_type=jnp.float32)     # (bt, 35) f32

    # Hidden epilogue in bf16 on v6e/v7x (halves VPU/EUP work on the
    # 35/128-lane-sparse tensor), f32 on v5e and older.
    h = _sigmoid_tanh(z1.astype(epilogue_dtype) + b1_ref[...])  # (bt, 35)

    # Layer 2 (out_features == 1): broadcast multiply + minor-axis reduce on
    # VPU/XLU; result lands directly in the lane-dense (nr, 128) output tile.
    # (Reviewed: keep unless the bundle dump shows relayout copies.)
    hw = (h * w2_ref[...]).astype(jnp.float32)                  # (bt, 35) f32
    y = jnp.sum(hw.reshape(nr, nl, HID_DIM), axis=-1)           # (nr, 128) f32
    y = _sigmoid_tanh(y + b2_ref[...])                          # (1,1) bias bcast

    o_ref[...] = y.astype(o_ref.dtype)


def _epilogue_dtype_for_backend():
    """bf16 epilogue only on chips with bf16 VPU/EUP (v6e / v7x)."""
    try:
        kind = jax.devices()[0].device_kind.lower()
    except Exception:
        return jnp.float32
    if any(old in kind for old in ("v2", "v3", "v4", "v5")):
        return jnp.float32
    return jnp.bfloat16


def passing_network(x, w1, b1, w2, b2, *, block_b=8192, epilogue_dtype=None):
    """x: (B, 104) f32; w1: (104, 35); b1: (35,); w2: (35, 1); b2: (1,) -> (B, 1) f32."""
    B, in_dim = x.shape
    assert in_dim == IN_DIM
    if epilogue_dtype is None:
        epilogue_dtype = _epilogue_dtype_for_backend()

    # Stream x as-is (f32). No wrapper-side cast, no wrapper-side pad.
    x = x.astype(jnp.float32)

    # ---- row tiling -----------------------------------------------------
    block_b = max(1024, (int(block_b) // 1024) * 1024)
    b_pad = pl.cdiv(B, _LANES) * _LANES              # 128-aligned output rows
    if b_pad >= 2048:
        # >= 2 grid steps so both v7x TensorCores get work; tile rows are a
        # multiple of 1024 so every output block keeps >= 8 sublanes.
        n_tiles = max(2, pl.cdiv(b_pad, block_b))
        bt = pl.cdiv(pl.cdiv(b_pad, n_tiles), 1024) * 1024
    else:
        bt = b_pad                                   # single (possibly partial) tile
    num_tiles = pl.cdiv(b_pad, bt)
    rows_per_tile = bt // _LANES
    out_rows = num_tiles * rows_per_tile

    # Tiny resident operands: w1 in bf16 for the MXU, b1/w2 in the epilogue
    # dtype, b2 stays f32 (final layer is f32).
    w1_bf16 = w1.astype(jnp.bfloat16)
    b1_row = b1.reshape(1, HID_DIM).astype(epilogue_dtype)
    w2_row = w2.reshape(1, HID_DIM).astype(epilogue_dtype)
    b2_2d = b2.reshape(1, 1).astype(jnp.float32)

    n_cover = num_tiles * bt
    epi_bytes = jnp.dtype(epilogue_dtype).itemsize
    cost = pl.CostEstimate(
        flops=2 * n_cover * (IN_DIM * HID_DIM + HID_DIM),
        transcendentals=n_cover * (HID_DIM + OUT_DIM),   # 1 tanh per sigmoid
        bytes_accessed=(B * IN_DIM * 4                    # x streamed in f32
                        + out_rows * _LANES * 4           # lane-dense f32 output
                        + IN_DIM * HID_DIM * 2            # w1 bf16
                        + 2 * HID_DIM * epi_bytes + 4),   # b1, w2, b2
    )

    kernel = functools.partial(_passing_net_kernel, epilogue_dtype=epilogue_dtype)

    out = pl.pallas_call(
        kernel,
        out_shape=jax.ShapeDtypeStruct((out_rows, _LANES), jnp.float32),
        grid=(num_tiles,),
        in_specs=[
            pl.BlockSpec((bt, IN_DIM), lambda i: (i, 0)),        # x: tiled over batch
            pl.BlockSpec((IN_DIM, HID_DIM), lambda i: (0, 0)),   # w1: resident
            pl.BlockSpec((1, HID_DIM), lambda i: (0, 0)),        # b1: resident
            pl.BlockSpec((1, HID_DIM), lambda i: (0, 0)),        # w2 row: resident
            pl.BlockSpec((1, 1), lambda i: (0, 0)),              # b2: resident
        ],
        out_specs=pl.BlockSpec((rows_per_tile, _LANES), lambda i: (i, 0)),
        compiler_params=pltpu.CompilerParams(
            dimension_semantics=("parallel",)),
        cost_estimate=cost,
    )(x, w1_bf16, b1_row, w2_row, b2_2d)

    # (out_rows, 128) row-major is exactly batch order -> free reshape + crop
    # (rows past B correspond to the ragged/padded region and are discarded).
    return out.reshape(out_rows * _LANES, OUT_DIM)[:B]


def init_params(key):
    """Deterministic init mirroring torch.nn.Linear's uniform(-1/sqrt(fan_in), ...)."""
    k1, k2, k3, k4 = jax.random.split(key, 4)
    bound1 = 1.0 / jnp.sqrt(IN_DIM)
    bound2 = 1.0 / jnp.sqrt(HID_DIM)
    # Stored as (in, out) = W^T relative to torch's (out, in).
    w1 = jax.random.uniform(k1, (IN_DIM, HID_DIM), jnp.float32, -bound1, bound1)
    b1 = jax.random.uniform(k2, (HID_DIM,), jnp.float32, -bound1, bound1)
    w2 = jax.random.uniform(k3, (HID_DIM, OUT_DIM), jnp.float32, -bound2, bound2)
    b2 = jax.random.uniform(k4, (OUT_DIM,), jnp.float32, -bound2, bound2)
    return w1, b1, w2, b2


if __name__ == "__main__":
    key = jax.random.PRNGKey(0)
    kx, kx2, kp = jax.random.split(key, 3)

    w1, b1, w2, b2 = init_params(kp)

    def ref_fn(xv):
        return jax.nn.sigmoid(jax.nn.sigmoid(xv @ w1 + b1) @ w2 + b2)

    # Small batch (single, partially-filled 128-row tile).
    B = 8
    x = jax.random.normal(kx, (B, IN_DIM), jnp.float32)
    out = jax.block_until_ready(passing_network(x, w1, b1, w2, b2))
    assert out.shape == (B, OUT_DIM)
    assert jnp.allclose(out, ref_fn(x), atol=5e-3, rtol=5e-3)

    # Multi-tile path: pipelined batch grid, >=2 tiles for megacore, ragged
    # last block (no wrapper pad). Still small/fast.
    B2 = 2500
    x2 = jax.random.normal(kx2, (B2, IN_DIM), jnp.float32)
    out2 = jax.block_until_ready(passing_network(x2, w1, b1, w2, b2, block_b=1024))
    assert out2.shape == (B2, OUT_DIM)
    assert jnp.allclose(out2, ref_fn(x2), atol=5e-3, rtol=5e-3)

    print("KERNEL_OK")
</pallas_src>

<mosaic_0001>
module attributes {stable_mosaic.version = 11 : i64} {
  func.func @_passing_net_kernel(%arg0: i32, %arg1: memref<128x104xf32, #tpu.memory_space<vmem>>, %arg2: memref<104x35xbf16, #tpu.memory_space<vmem>>, %arg3: memref<1x35xbf16, #tpu.memory_space<vmem>>, %arg4: memref<1x35xbf16, #tpu.memory_space<vmem>>, %arg5: memref<1x1xf32, #tpu.memory_space<vmem>>, %arg6: memref<1x128xf32, #tpu.memory_space<vmem>>) attributes {dimension_semantics = [#tpu.dimension_semantics<parallel>], iteration_bounds = array<i64: 1>, scalar_prefetch = 0 : i64, scratch_operands = 0 : i64, tpu.core_type = #tpu.core_type<tc>, window_params = [{transform_indices = @transform_0, window_bounds = array<i64: 128, 104>}, {pipeline_mode = #tpu.pipeline_mode<synchronous>, transform_indices = @transform_1, window_bounds = array<i64: 104, 35>}, {pipeline_mode = #tpu.pipeline_mode<synchronous>, transform_indices = @transform_2, window_bounds = array<i64: 1, 35>}, {pipeline_mode = #tpu.pipeline_mode<synchronous>, transform_indices = @transform_3, window_bounds = array<i64: 1, 35>}, {pipeline_mode = #tpu.pipeline_mode<synchronous>, transform_indices = @transform_4, window_bounds = array<i64: 1, 1>}, {transform_indices = @transform_5, window_bounds = array<i64: 1, 128>}]} {
    %c0 = arith.constant 0 : index
    %c0_0 = arith.constant 0 : index
    %0 = vector.load %arg1[%c0, %c0_0] : memref<128x104xf32, #tpu.memory_space<vmem>>, vector<128x104xf32>
    %1 = arith.truncf %0 : vector<128x104xf32> to vector<128x104xbf16>
    %c0_1 = arith.constant 0 : index
    %c0_2 = arith.constant 0 : index
    %2 = vector.load %arg2[%c0_1, %c0_2] : memref<104x35xbf16, #tpu.memory_space<vmem>>, vector<104x35xbf16>
    %cst = arith.constant dense<0.000000e+00> : vector<128x35xf32>
    %3 = tpu.matmul %1, %2, %cst {dimension_numbers = #tpu.dot_dimension_numbers<[1], [0], [0], [1], [0, 0, 1, 1], [], []>} : vector<128x104xbf16>, vector<104x35xbf16>, vector<128x35xf32> -> vector<128x35xf32>
    %4 = arith.truncf %3 : vector<128x35xf32> to vector<128x35xbf16>
    %c0_3 = arith.constant 0 : index
    %c0_4 = arith.constant 0 : index
    %5 = vector.load %arg3[%c0_3, %c0_4] : memref<1x35xbf16, #tpu.memory_space<vmem>>, vector<1x35xbf16>
    %6 = vector.broadcast %5 : vector<1x35xbf16> to vector<128x35xbf16>
    %7 = arith.addf %4, %6 : vector<128x35xbf16>
    %cst_5 = arith.constant 5.000000e-01 : bf16
    %8 = vector.broadcast %cst_5 : bf16 to vector<128x35xbf16>
    %9 = arith.mulf %8, %7 : vector<128x35xbf16>
    %10 = math.tanh %9 : vector<128x35xbf16>
    %cst_6 = arith.constant 5.000000e-01 : bf16
    %11 = vector.broadcast %cst_6 : bf16 to vector<128x35xbf16>
    %12 = arith.mulf %11, %10 : vector<128x35xbf16>
    %cst_7 = arith.constant 5.000000e-01 : bf16
    %13 = vector.broadcast %cst_7 : bf16 to vector<128x35xbf16>
    %14 = arith.addf %12, %13 : vector<128x35xbf16>
    %c0_8 = arith.constant 0 : index
    %c0_9 = arith.constant 0 : index
    %15 = vector.load %arg4[%c0_8, %c0_9] : memref<1x35xbf16, #tpu.memory_space<vmem>>, vector<1x35xbf16>
    %16 = vector.broadcast %15 : vector<1x35xbf16> to vector<128x35xbf16>
    %17 = arith.mulf %14, %16 : vector<128x35xbf16>
    %18 = arith.extf %17 : vector<128x35xbf16> to vector<128x35xf32>
    %19 = vector.shape_cast %18 : vector<128x35xf32> to vector<1x128x35xf32>
    %cst_10 = arith.constant dense<0.000000e+00> : vector<1x128xf32>
    %20 = vector.multi_reduction <add>, %19, %cst_10 [2] : vector<1x128x35xf32> to vector<1x128xf32>
    %c0_11 = arith.constant 0 : index
    %c0_12 = arith.constant 0 : index
    %21 = vector.load %arg5[%c0_11, %c0_12] : memref<1x1xf32, #tpu.memory_space<vmem>>, vector<1x1xf32>
    %22 = vector.broadcast %21 : vector<1x1xf32> to vector<1x128xf32>
    %23 = arith.addf %20, %22 : vector<1x128xf32>
    %cst_13 = arith.constant 5.000000e-01 : f32
    %24 = vector.broadcast %cst_13 : f32 to vector<1x128xf32>
    %25 = arith.mulf %24, %23 : vector<1x128xf32>
    %26 = math.tanh %25 : vector<1x128xf32>
    %cst_14 = arith.constant 5.000000e-01 : f32
    %27 = vector.broadcast %cst_14 : f32 to vector<1x128xf32>
    %28 = arith.mulf %27, %26 : vector<1x128xf32>
    %cst_15 = arith.constant 5.000000e-01 : f32
    %29 = vector.broadcast %cst_15 : f32 to vector<1x128xf32>
    %30 = arith.addf %28, %29 : vector<1x128xf32>
    %c0_16 = arith.constant 0 : index
    %c0_17 = arith.constant 0 : index
    %31 = vector.load %arg6[%c0_16, %c0_17] : memref<1x128xf32, #tpu.memory_space<vmem>>, vector<1x128xf32>
    tpu.vector_store %arg6[%c0_16, %c0_17], %30 {strides = array<i32>} : memref<1x128xf32, #tpu.memory_space<vmem>>, vector<1x128xf32>,
    return
  }
  func.func @transform_0(%arg0: i32) -> (i32, i32) {
    %c0_i32 = arith.constant 0 : i32
    %c0_i32_0 = arith.constant 0 : i32
    return %arg0, %c0_i32 : i32, i32
  }
  func.func @transform_1(%arg0: i32) -> (i32, i32) {
    %c0_i32 = arith.constant 0 : i32
    %c0_i32_0 = arith.constant 0 : i32
    %c0_i32_1 = arith.constant 0 : i32
    return %c0_i32, %c0_i32_0 : i32, i32
  }
  func.func @transform_2(%arg0: i32) -> (i32, i32) {
    %c0_i32 = arith.constant 0 : i32
    %c0_i32_0 = arith.constant 0 : i32
    %c0_i32_1 = arith.constant 0 : i32
    return %c0_i32, %c0_i32_0 : i32, i32
  }
  func.func @transform_3(%arg0: i32) -> (i32, i32) {
    %c0_i32 = arith.constant 0 : i32
    %c0_i32_0 = arith.constant 0 : i32
    %c0_i32_1 = arith.constant 0 : i32
    return %c0_i32, %c0_i32_0 : i32, i32
  }
  func.func @transform_4(%arg0: i32) -> (i32, i32) {
    %c0_i32 = arith.constant 0 : i32
    %c0_i32_0 = arith.constant 0 : i32
    %c0_i32_1 = arith.constant 0 : i32
    return %c0_i32, %c0_i32_0 : i32, i32
  }
  func.func @transform_5(%arg0: i32) -> (i32, i32) {
    %c0_i32 = arith.constant 0 : i32
    %c0_i32_0 = arith.constant 0 : i32
    return %arg0, %c0_i32 : i32, i32
  }
}

</mosaic_0001>

<bundles_post_ra>
// kernel: tpu_custom_call.1
= control target key start
LH: loop header
LB: loop body
LE: loop exit
PB: predicated region body
PF: predicated region fallthrough
CT: control target
= control target key end

     0   :  { %s980_s0 = inlined_call_operand.vmem [shape: f32[8,104], index: 0, kind: input, shape index: {}]   ;;  %s981_s1 = inlined_call_operand.vmem [shape: bf16[104,35], index: 1, kind: input, shape index: {}]   ;;  %s982_s2 = inlined_call_operand.vmem [shape: bf16[1,35], index: 2, kind: input, shape index: {}]   ;;  %s983_s3 = inlined_call_operand.vmem [shape: bf16[1,35], index: 3, kind: input, shape index: {}]   ;;  %s984_s4 = inlined_call_operand.<no memory space> [shape: f32[1,1], index: 4, kind: input, shape index: {}]   ;;  %s985_s5 = inlined_call_operand.hbm [shape: f32[1,128], index: 5, kind: output, shape index: {}]  }
   0x1   :  { %v10_v0 = vstv %s984_s4 }
   0x2   :  { %11 = vst [vmem:[#allocation2] sm:$0x1] %v10_v0 }
   0x3   :  { %v677_v1 = vld [vmem:[%s981_s1] sm:$0xff]   ;;  %v678_v2 = vld [vmem:[%s981_s1 + $0x8] sm:$0xff]   ;;  %v679_v3 = vld [vmem:[%s981_s1 + $0x10] sm:$0xff]   ;;  %vm101_vm0 = vcmask 850944  }
   0x4   :  { %627 = vmatprep.subr.bf16.mxu0 %v677_v1  ;;  %657 = vmatprep.subr.bf16.mxu1 %v677_v1  ;;  %v25_v4 = vld [vmem:[%s980_s0] sm:$0xff]  ;;  %v26_v5 = vld [vmem:[%s980_s0 + $0x8] sm:$0xff]  ;;  %v680_v6 = vld [vmem:[%s981_s1 + $0x18] sm:$0xff]  }
   0x5   :  { %628 = vmatpush3.bf16.msra.mxu0 %v677_v1  ;;  %664 = vmatpush3.bf16.msra.mxu1 %v677_v1  ;;  %v41_v7 = vpack.c.bf16 %v26_v5, %v25_v4  ;;  %v33_v8 = vld [vmem:[%s980_s0 + $0x40] sm:$0xff]  ;;  %v34_v9 = vld [vmem:[%s980_s0 + $0x48] sm:$0xff] }
   0x6   :  { %629 = vmatprep.subr.bf16.mxu0 %v678_v2  ;;  %658 = vmatprep.subr.bf16.mxu1 %v678_v2  ;;  %v45_v10 = vpack.c.bf16 %v34_v9, %v33_v8  ;;  %v681_v11 = vld [vmem:[%s981_s1 + $0x20] sm:$0xff]  }
   0x7   :  { %641 = vmatprep.mubr.msk.bf16.mxu0 %vm101_vm0, %v41_v7 }
   0x9   :  { %630 = vmatpush3.bf16.msra.mxu0 %v678_v2  ;;  %665 = vmatpush3.bf16.msra.mxu1 %v678_v2 }
   0xa   :  { %631 = vmatprep.subr.bf16.mxu0 %v679_v3  ;;  %659 = vmatprep.subr.bf16.mxu1 %v679_v3 }
   0xd   :  { %632 = vmatpush3.bf16.msra.mxu0 %v679_v3  ;;  %666 = vmatpush3.bf16.msra.mxu1 %v679_v3 }
   0xe   :  { %633 = vmatprep.subr.bf16.mxu0 %v680_v6  ;;  %660 = vmatprep.subr.bf16.mxu1 %v680_v6 }
   0xf   :  { %12 = vsyncpa [#allocation4], 0  ;;  %649 = vmatprep.mubr.msk.bf16.mxu1 %vm101_vm0, %v45_v10  ;;  %v682_v12 = vld [vmem:[%s981_s1 + $0x28] sm:$0xff]   ;;  %v683_v13 = vld [vmem:[%s981_s1 + $0x30] ss:$0 sps:$4 sm:$0xff]   ;;  %vm126_vm1 = vcmask 1043456   ;;  %v239_v34 = vlaneseq }
  0x10   :  { %v27_v14 = vld [vmem:[%s980_s0 + $0x10] sm:$0xff]  ;;  %v28_v15 = vld [vmem:[%s980_s0 + $0x18] sm:$0xff]  ;;  %v29_v16 = vld [vmem:[%s980_s0 + $0x20] sm:$0xff]  ;;  %v128_v19 = vsel %vm126_vm1, %v683_v13, 0  ;;  %v756_v33 = vmov 0   ;;  %vm315_vm2 = vcmask 285696  }
  0x11   :  { %634 = vmatpush3.bf16.msra.mxu0 %v680_v6  ;;  %667 = vmatpush3.bf16.msra.mxu1 %v680_v6  ;;  %v35_v17 = vld [vmem:[%s980_s0 + $0x50] sm:$0xff]  ;;  %v36_v18 = vld [vmem:[%s980_s0 + $0x58] sm:$0xff]  ;;  %v30_v20 = vld [vmem:[%s980_s0 + $0x28] sm:$0xff]  ;;  %v42_v23 = vpack.c.bf16 %v28_v15, %v27_v14  ;;  %v869_v35 = vshrl.u32 %v239_v34, 7  ;;  %vm481_vm3 = vcmask 130112   ;;  %vm488_vm4 = vcmask 195712  }
  0x12   :  { %635 = vmatprep.subr.bf16.mxu0 %v681_v11  ;;  %661 = vmatprep.subr.bf16.mxu1 %v681_v11  ;;  %v37_v21 = vld [vmem:[%s980_s0 + $0x60] sm:$0xff]  ;;  %v38_v22 = vld [vmem:[%s980_s0 + $0x68] sm:$0xff]  ;;  %v46_v24 = vpack.c.bf16 %v36_v18, %v35_v17  ;;  %v43_v25 = vpack.c.bf16 %v30_v20, %v29_v16  ;;  %v31_v27 = vld [vmem:[%s980_s0 + $0x30] sm:$0xff]  ;;  %vm495_vm5 = vcmask 261312   ;;  %vm502_vm6 = vcmask 326912  }
  0x13   :  { %v47_v26 = vpack.c.bf16 %v38_v22, %v37_v21  ;;  %v32_v28 = vld [vmem:[%s980_s0 + $0x38] sm:$0xff]  ;;  %v39_v29 = vld [vmem:[%s980_s0 + $0x70] sm:$0xff]  ;;  %675 = vset.pattern.permute.xlu1 %v756_v33  ;;  %676 = vset.pattern.permute.xlu0 %v756_v33  ;;  %v235_v36 = vld [vmem:[%s982_s2] sm:$0x1]  ;;  %v875_v38 = vsub.s32 0, %v869_v35  ;;  %vm509_vm7 = vcmask 392512  }
  0x14   :  { %v40_v30 = vld [vmem:[%s980_s0 + $0x78] sm:$0xff]  ;;  %v44_v31 = vpack.c.bf16 %v32_v28, %v31_v27  ;;  %v237_v37 = vpack.i.b16 %v235_v36, %v235_v36  ;;  %v283_v8 = vld [vmem:[%s983_s3] sm:$0x1]  ;;  %vm516_vm8 = vcmask 458112   ;;  %vm523_vm9 = vcmask 523712   ;;  %s757_s3 = smov [#allocation3]  }
  0x15   :  { %636 = vmatpush3.bf16.msra.mxu0 %v681_v11  ;;  %668 = vmatpush3.bf16.msra.mxu1 %v681_v11  ;;  %v48_v32 = vpack.c.bf16 %v40_v30, %v39_v29  ;;  %vm530_vm10 = vcmask 589312   ;;  %vm537_vm11 = vcmask 654912   ;;  %vm544_vm12 = vcmask 720512   ;;  %s589_s15 = sshll.u32 %s757_s3, 4  ;;  %s590_s15 = int_to_ptr.vmem [resolvable:$true] %s589_s15 }
  0x16   :  { %637 = vmatprep.subr.bf16.mxu0 %v682_v12  ;;  %662 = vmatprep.subr.bf16.mxu1 %v682_v12  ;;  %v242_v42 = vrot.slane %v237_v37, %v875_v38  ;;  %vm551_vm13 = vcmask 786112   ;;  %vm558_vm14 = vcmask 851712   ;;  %vm565_vm15 = vcmask 917312   ;;  %s732_s16 = scalar_lea.vmem %s590_s15, 16  ;;  %s736_s17 = scalar_lea.vmem %s590_s15, 32 }
  0x17   :  { %p733_p0 = scmp.ne.s32.totalorder %s590_s15, %s732_s16  ;;  %p737_p1 = scmp.lt.s32.totalorder %s590_s15, %s590_s15 }
  0x18   :  { %p738_p2 = scmp.lt.s32.totalorder %s736_s17, %s732_s16 }
  0x19   :  { %638 = vmatpush3.bf16.msra.mxu0 %v682_v12  ;;  %669 = vmatpush3.bf16.msra.mxu1 %v682_v12  ;;  %v285_v12 = vpack.i.b16 %v283_v8, %v283_v8 }
  0x1a   :  { %671 = vmatprep.subr.msk.bf16.mxu0 %vm126_vm1, %v683_v13  ;;  %672 = vmatprep.subr.msk.bf16.mxu1 %vm126_vm1, %v683_v13  ;;  %vm579_vm1 = vcmask 1048512   ;;  %p739_p3 = por %p738_p2, %p737_p1 }
  0x1b   :  { %v882_v17 = vrot.slane %v285_v12, %v875_v38 }
  0x1c   :  { %p740_p4 = pnand %p739_p3, %p733_p0 }
  0x1d   :  { %640 = vmatpush3.bf16.msra.mxu0 %v128_v19  ;;  %670 = vmatpush3.bf16.msra.mxu1 %v128_v19 }
  0x20   :  { %642 = vmatmul.mubr.msk.bf16.vlgmr.msra.gmra.mrb[0].mxu0 %vm101_vm0, %v42_v23  ;;  %650 = vmatmul.mubr.msk.bf16.vlgmr.msra.gmra.mrb[0].mxu1 %vm101_vm0, %v46_v24 }
  0x21   :  { %645 = vmatprep.mubr.msk.bf16.mxu0 %vm101_vm0, %v43_v25  ;;  %653 = vmatprep.mubr.msk.bf16.mxu1 %vm101_vm0, %v47_v26 }
  0x28   :  { %646 = vmatmul.mubr.msk.bf16.gmra.mrb[4].mxu0 %vm101_vm0, %v44_v31  ;;  %654 = vmatmul.mubr.msk.bf16.gmra.mrb[4].mxu1 %vm101_vm0, %v48_v32  ;;  %vm572_vm0 = vcmask 982912  }
  0xf3   :  { %v643_v39 = vpop.f32.mrb[0].mxu0  ;;  %v651_v40 = vpop.f32.mrb[0].mxu1 }
  0xf4   :  { %v164_v41 = vpop.f32.mrb[1].mxu0  ;;  %v196_v43 = vpop.f32.mrb[1].mxu1 }
  0xf5   :  { %v644_v44 = vpop.f32.mrb[2].mxu0  ;;  %v652_v45 = vpop.f32.mrb[2].mxu1 }
  0xf6   :  { %v228_v46 = vpack.c.bf16 %v644_v44, %v643_v39  ;;  %v167_v47 = vpop.f32.mrb[3].mxu0  ;;  %v232_v48 = vpack.c.bf16 %v652_v45, %v651_v40  ;;  %v199_v49 = vpop.f32.mrb[3].mxu1 }
  0xf7   :  { %v227_v50 = vpack.c.bf16 %v167_v47, %v164_v41  ;;  %v231_v51 = vpack.c.bf16 %v199_v49, %v196_v43 }
  0xf8   :  { %v244_v52 = vadd.bf16 %v242_v42, %v228_v46  ;;  %v248_v11 = vadd.bf16 %v242_v42, %v232_v48 }
  0xf9   :  { %v243_v53 = vadd.bf16 %v242_v42, %v227_v50  ;;  %v247_v57 = vadd.bf16 %v242_v42, %v231_v51 }
  0xfa   :  { %v252_v54 = vmul.bf16 1056980736, %v244_v52  ;;  %v256_v15 = vmul.bf16 1056980736, %v248_v11 }
  0xfb   :  { %v251_v55 = vmul.bf16 1056980736, %v243_v53  ;;  %v647_v56 = vpop.f32.mrb[4].mxu0  ;;  %v655_v58 = vpop.f32.mrb[4].mxu1  ;;  %v255_v4 = vmul.bf16 1056980736, %v247_v57 }
  0xfc   :  { %684 = vtanh.bf16 %v252_v54  ;;  %v180_v59 = vpop.f32.mrb[5].mxu0  ;;  %v212_v60 = vpop.f32.mrb[5].mxu1 }
  0xfd   :  { %686 = vtanh.bf16 %v251_v55  ;;  %v648_v61 = vpop.f32.mrb[6].mxu0  ;;  %v656_v62 = vpop.f32.mrb[6].mxu1 }
  0xfe   :  { %v230_v63 = vpack.c.bf16 %v648_v61, %v647_v56  ;;  %v183_v0 = vpop.f32.mrb[7].mxu0  ;;  %v234_v1 = vpack.c.bf16 %v656_v62, %v655_v58  ;;  %v215_v2 = vpop.f32.mrb[7].mxu1  ;;  %688 = vtanh.bf16 %v255_v4 }
  0xff   :  { %v229_v3 = vpack.c.bf16 %v183_v0, %v180_v59  ;;  %v233_v5 = vpack.c.bf16 %v215_v2, %v212_v60 }
 0x100   :  { %v246_v6 = vadd.bf16 %v242_v42, %v230_v63  ;;  %v250_v19 = vadd.bf16 %v242_v42, %v234_v1 }
 0x101   :  { %v245_v7 = vadd.bf16 %v242_v42, %v229_v3  ;;  %v249_v23 = vadd.bf16 %v242_v42, %v233_v5 }
 0x102   :  { %v254_v9 = vmul.bf16 1056980736, %v246_v6  ;;  %v258_v25 = vmul.bf16 1056980736, %v250_v19 }
 0x103   :  { %v253_v10 = vmul.bf16 1056980736, %v245_v7  ;;  %v257_v36 = vmul.bf16 1056980736, %v249_v23 }
 0x104   :  { %690 = vtanh.bf16 %v254_v9 }
 0x105   :  { %692 = vtanh.bf16 %v253_v10  ;;  %v364_v10 = vld [vmem:[#allocation2] sm:$0x1] }
 0x106   :  { %694 = vtanh.bf16 %v256_v15 }
 0x107   :  { %v685_v13 = vpop.eup %684  ;;  %696 = vtanh.bf16 %v258_v25 }
 0x108   :  { %v687_v14 = vpop.eup %686  ;;  %v268_v16 = vmul.bf16 1056980736, %v685_v13  ;;  %698 = vtanh.bf16 %v257_v36 }
 0x109   :  { %v267_v18 = vmul.bf16 1056980736, %v687_v14  ;;  %v689_v26 = vpop.eup %688 }
 0x10a   :  { %v276_v20 = vadd.bf16 1056980736, %v268_v16  ;;  %v271_v42 = vmul.bf16 1056980736, %v689_v26 }
 0x10b   :  { %v275_v21 = vadd.bf16 1056980736, %v267_v18 }
 0x10c   :  { %v292_v22 = vmul.bf16 %v882_v17, %v276_v20  ;;  %v279_v51 = vadd.bf16 1056980736, %v271_v42 }
 0x10d   :  { %v291_v24 = vmul.bf16 %v882_v17, %v275_v21 }
 0x10e   :  { %v301_v27 = vunpack.c.l.bf16 %v292_v22  ;;  %v302_v33 = vunpack.c.h.bf16 %v292_v22  ;;  %v295_v56 = vmul.bf16 %v882_v17, %v279_v51 }
 0x10f   :  { %v691_v28 = vpop.eup %690  ;;  %v299_v29 = vunpack.c.l.bf16 %v291_v24  ;;  %v300_v40 = vunpack.c.h.bf16 %v291_v24 }
 0x110   :  { %v693_v30 = vpop.eup %692  ;;  %v270_v31 = vmul.bf16 1056980736, %v691_v28  ;;  %v322_v32 = vsel %vm315_vm2, %v301_v27, 0.0  ;;  %v325_v44 = vsel %vm315_vm2, %v302_v33, 0.0  ;;  %v307_v62 = vunpack.c.l.bf16 %v295_v56 }
 0x111   :  { %v269_v37 = vmul.bf16 1056980736, %v693_v30  ;;  %323 = vadd.xlane.f32.xlu1 %v322_v32  ;;  %v316_v39 = vsel %vm315_vm2, %v299_v29, 0.0  ;;  %v319_v46 = vsel %vm315_vm2, %v300_v40, 0.0  ;;  %v695_v49 = vpop.eup %694  ;;  %v308_v4 = vunpack.c.h.bf16 %v295_v56 }
 0x112   :  { %317 = vadd.xlane.f32.xlu0 %v316_v39  ;;  %v278_v41 = vadd.bf16 1056980736, %v270_v31  ;;  %v272_v55 = vmul.bf16 1056980736, %v695_v49  ;;  %v697_v57 = vpop.eup %696  ;;  %v340_v3 = vsel %vm315_vm2, %v307_v62, 0.0 }
 0x113   :  { %v277_v43 = vadd.bf16 1056980736, %v269_v37  ;;  %v274_v61 = vmul.bf16 1056980736, %v697_v57  ;;  %v699_v63 = vpop.eup %698  ;;  %v343_v6 = vsel %vm315_vm2, %v308_v4, 0.0 }
 0x114   :  { %v294_v45 = vmul.bf16 %v882_v17, %v278_v41  ;;  %v280_v60 = vadd.bf16 1056980736, %v272_v55  ;;  %v273_v2 = vmul.bf16 1056980736, %v699_v63 }
 0x115   :  { %326 = vadd.xlane.f32.xlu1 %v325_v44  ;;  %v293_v47 = vmul.bf16 %v882_v17, %v277_v43  ;;  %v282_v5 = vadd.bf16 1056980736, %v274_v61 }
 0x116   :  { %320 = vadd.xlane.f32.xlu0 %v319_v46  ;;  %v305_v48 = vunpack.c.l.bf16 %v294_v45  ;;  %v306_v59 = vunpack.c.h.bf16 %v294_v45  ;;  %v296_v1 = vmul.bf16 %v882_v17, %v280_v60  ;;  %v281_v9 = vadd.bf16 1056980736, %v273_v2 }
 0x117   :  { %v304_v50 = vunpack.c.h.bf16 %v293_v47  ;;  %v303_v54 = vunpack.c.l.bf16 %v293_v47  ;;  %v298_v8 = vmul.bf16 %v882_v17, %v282_v5 }
 0x118   :  { %v334_v52 = vsel %vm315_vm2, %v305_v48, 0.0  ;;  %v337_v0 = vsel %vm315_vm2, %v306_v59, 0.0  ;;  %v309_v7 = vunpack.c.l.bf16 %v296_v1  ;;  %v297_v13 = vmul.bf16 %v882_v17, %v281_v9 }
 0x119   :  { %v331_v53 = vsel %vm315_vm2, %v304_v50, 0.0  ;;  %v328_v58 = vsel %vm315_vm2, %v303_v54, 0.0  ;;  %v313_v12 = vunpack.c.l.bf16 %v298_v8  ;;  %v314_v20 = vunpack.c.h.bf16 %v298_v8 }
 0x11a   :  { %335 = vadd.xlane.f32.xlu0 %v334_v52  ;;  %332 = vadd.xlane.f32.xlu1 %v331_v53  ;;  %v346_v11 = vsel %vm315_vm2, %v309_v7, 0.0  ;;  %v311_v15 = vunpack.c.l.bf16 %v297_v13  ;;  %v312_v18 = vunpack.c.h.bf16 %v297_v13  ;;  %v310_v22 = vunpack.c.h.bf16 %v296_v1 }
 0x11b   :  { %v358_v14 = vsel %vm315_vm2, %v313_v12, 0.0  ;;  %v361_v21 = vsel %vm315_vm2, %v314_v20, 0.0  ;;  %v918_v52 = vand.u32 127, %v239_v34 }
 0x11c   :  { %v352_v16 = vsel %vm315_vm2, %v311_v15, 0.0  ;;  %v355_v19 = vsel %vm315_vm2, %v312_v18, 0.0  ;;  %v349_v23 = vsel %vm315_vm2, %v310_v22, 0.0 }
 0x11d   :  { %v476_v61 = vadd.s32 4294967288, %v918_v52  ;;  %v483_v4 = vadd.s32 4294967280, %v918_v52 }
 0x11e   :  { %329 = vadd.xlane.f32.xlu0 %v328_v58 }
 0x11f   :  { %v479_v8 = vsub.s32 %v476_v61, %v869_v35 }
 0x122   :  { %338 = vadd.xlane.f32.xlu0 %v337_v0 }
 0x126   :  { %341 = vadd.xlane.f32.xlu0 %v340_v3  ;;  %v474_v3 = vsub.s32 %v918_v52, %v869_v35 }
 0x12a   :  { %344 = vadd.xlane.f32.xlu0 %v343_v6 }
 0x12b   :  { %367 = vperm.xlu1 %675, %v364_v10  }
 0x12e   :  { %347 = vadd.xlane.f32.xlu0 %v346_v11  ;;  %v490_v11 = vadd.s32 4294967272, %v918_v52 }
 0x132   :  { %359 = vadd.xlane.f32.xlu0 %v358_v14 }
 0x136   :  { %353 = vadd.xlane.f32.xlu0 %v352_v16  ;;  %v486_v16 = vsub.s32 %v483_v4, %v869_v35 }
 0x13a   :  { %356 = vadd.xlane.f32.xlu0 %v355_v19 }
 0x13e   :  { %362 = vadd.xlane.f32.xlu0 %v361_v21 }
 0x14f   :  { %350 = vadd.xlane.f32.xlu1 %v349_v23 }
 0x19e   :  { %v324_v17 = vpop.xlane.xlu1 %323 }
 0x19f   :  { %v318_v24 = vpop.xlane.xlu0 %317 }
 0x1a2   :  { %v327_v26 = vpop.xlane.xlu1 %326 }
 0x1a3   :  { %v321_v25 = vpop.xlane.xlu0 %320 }
 0x1a7   :  { %v336_v27 = vpop.xlane.xlu0 %335  ;;  %v333_v28 = vpop.xlane.xlu1 %332 }
 0x1ab   :  { %v330_v29 = vpop.xlane.xlu0 %329  ;;  %v368_v31 = vpop.permute.xlu1 %367 }
 0x1ac   :  { %v909_v33 = vrot.slane %v368_v31, %v875_v38 }
 0x1ae   :  { %v374_v37 = vadd.f32 %v909_v33, %v318_v24  ;;  %v375_v39 = vadd.f32 %v909_v33, %v321_v25  ;;  %v376_v40 = vadd.f32 %v909_v33, %v324_v17  ;;  %v377_v45 = vadd.f32 %v909_v33, %v327_v26 }
 0x1af   :  { %v339_v30 = vpop.xlane.xlu0 %338  ;;  %v378_v38 = vadd.f32 %v909_v33, %v330_v29  ;;  %v379_v48 = vadd.f32 %v909_v33, %v333_v28  ;;  %v380_v53 = vadd.f32 %v909_v33, %v336_v27  ;;  %v497_v24 = vadd.s32 4294967264, %v918_v52 }
 0x1b0   :  { %v390_v41 = vmul.f32 0.5, %v374_v37  ;;  %v391_v43 = vmul.f32 0.5, %v375_v39  ;;  %v392_v44 = vmul.f32 0.5, %v376_v40  ;;  %v393_v47 = vmul.f32 0.5, %v377_v45 }
 0x1b1   :  { %v394_v49 = vmul.f32 0.5, %v378_v38  ;;  %v395_v55 = vmul.f32 0.5, %v379_v48  ;;  %v381_v56 = vadd.f32 %v909_v33, %v339_v30  ;;  %v396_v62 = vmul.f32 0.5, %v380_v53 }
 0x1b2   :  { %700 = vtanh.f32 %v390_v41  ;;  %v504_v37 = vadd.s32 4294967256, %v918_v52 }
 0x1b3   :  { %v342_v32 = vpop.xlane.xlu0 %341  ;;  %702 = vtanh.f32 %v391_v43  ;;  %v397_v0 = vmul.f32 0.5, %v381_v56 }
 0x1b4   :  { %704 = vtanh.f32 %v392_v44  ;;  %v382_v57 = vadd.f32 %v909_v33, %v342_v32  ;;  %v493_v32 = vsub.s32 %v490_v11, %v869_v35 }
 0x1b5   :  { %706 = vtanh.f32 %v393_v47 }
 0x1b6   :  { %708 = vtanh.f32 %v394_v49  ;;  %v398_v5 = vmul.f32 0.5, %v382_v57 }
 0x1b7   :  { %v345_v36 = vpop.xlane.xlu0 %344  ;;  %710 = vtanh.f32 %v395_v55  ;;  %v507_v55 = vsub.s32 %v504_v37, %v869_v35 }
 0x1b8   :  { %v383_v34 = vadd.f32 %v909_v33, %v345_v36  ;;  %712 = vtanh.f32 %v396_v62 }
 0x1b9   :  { %714 = vtanh.f32 %v397_v0 }
 0x1ba   :  { %v399_v10 = vmul.f32 0.5, %v383_v34  ;;  %716 = vtanh.f32 %v398_v5 }
 0x1bb   :  { %v348_v42 = vpop.xlane.xlu0 %347 }
 0x1bc   :  { %v701_v51 = vpop.eup %700  ;;  %v384_v1 = vadd.f32 %v909_v33, %v348_v42  ;;  %718 = vtanh.f32 %v399_v10  ;;  %v500_v42 = vsub.s32 %v497_v24, %v869_v35  ;;  %v567_v24 = vadd.s32 4294967184, %v918_v52 }
 0x1bd   :  { %v703_v54 = vpop.eup %702  ;;  %v422_v59 = vmul.f32 0.5, %v701_v51 }
 0x1be   :  { %v705_v58 = vpop.eup %704  ;;  %v423_v60 = vmul.f32 0.5, %v703_v54  ;;  %v400_v12 = vmul.f32 0.5, %v384_v1  ;;  %v532_v1 = vadd.s32 4294967224, %v918_v52 }
 0x1bf   :  { %v360_v46 = vpop.xlane.xlu0 %359  ;;  %v424_v2 = vmul.f32 0.5, %v705_v58  ;;  %v438_v6 = vadd.f32 0.5, %v422_v59  ;;  %v707_v9 = vpop.eup %706  ;;  %v518_v58 = vadd.s32 4294967240, %v918_v52 }
 0x1c0   :  { %v439_v7 = vadd.f32 0.5, %v423_v60  ;;  %v709_v19 = vpop.eup %708  ;;  %v425_v20 = vmul.f32 0.5, %v707_v9  ;;  %v388_v23 = vadd.f32 %v909_v33, %v360_v46  ;;  %720 = vtanh.f32 %v400_v12 }
 0x1c1   :  { %v440_v15 = vadd.f32 0.5, %v424_v2  ;;  %v475_v21 = vrot.slane %v438_v6, %v474_v3  ;;  %v711_v26 = vpop.eup %710  ;;  %v426_v28 = vmul.f32 0.5, %v709_v19  ;;  %v525_v60 = vadd.s32 4294967232, %v918_v52 }
 0x1c2   :  { %v480_v22 = vrot.slane %v439_v7, %v479_v8  ;;  %v441_v30 = vadd.f32 0.5, %v425_v20  ;;  %v404_v36 = vmul.f32 0.5, %v388_v23  ;;  %v713_v40 = vpop.eup %712  ;;  %v427_v41 = vmul.f32 0.5, %v711_v26 }
 0x1c3   :  { %v354_v50 = vpop.xlane.xlu0 %353  ;;  %v487_v27 = vrot.slane %v440_v15, %v486_v16  ;;  %v442_v45 = vadd.f32 0.5, %v426_v28  ;;  %v715_v38 = vpop.eup %714  ;;  %v428_v49 = vmul.f32 0.5, %v713_v40  ;;  %v539_v3 = vadd.s32 4294967216, %v918_v52 }
 0x1c4   :  { %v386_v13 = vadd.f32 %v909_v33, %v354_v50  ;;  %v482_v31 = vsel %vm481_vm3, %v480_v22, %v475_v21  ;;  %v494_v47 = vrot.slane %v441_v30, %v493_v32  ;;  %v717_v48 = vpop.eup %716  ;;  %v511_v50 = vadd.s32 4294967248, %v918_v52 }
 0x1c5   :  { %v489_v44 = vsel %vm488_vm4, %v487_v27, %v482_v31  ;;  %v443_v53 = vadd.f32 0.5, %v427_v41  ;;  %v501_v57 = vrot.slane %v442_v45, %v500_v42  ;;  %v429_v59 = vmul.f32 0.5, %v715_v38 }
 0x1c6   :  { %v402_v25 = vmul.f32 0.5, %v386_v13  ;;  %v496_v54 = vsel %vm495_vm5, %v494_v47, %v489_v44  ;;  %v719_v56 = vpop.eup %718  ;;  %v444_v62 = vadd.f32 0.5, %v428_v49  ;;  %v430_v34 = vmul.f32 0.5, %v717_v48 }
 0x1c7   :  { %v357_v63 = vpop.xlane.xlu0 %356  ;;  %v503_v61 = vsel %vm502_vm6, %v501_v57, %v496_v54  ;;  %v508_v0 = vrot.slane %v443_v53, %v507_v55  ;;  %v431_v2 = vmul.f32 0.5, %v719_v56  ;;  %v521_v4 = vsub.s32 %v518_v58, %v869_v35 }
 0x1c8   :  { %v387_v18 = vadd.f32 %v909_v33, %v357_v63  ;;  %722 = vtanh.f32 %v402_v25  ;;  %v514_v63 = vsub.s32 %v511_v50, %v869_v35  ;;  %v445_v8 = vadd.f32 0.5, %v429_v59 }
 0x1c9   :  { %v510_v7 = vsel %vm509_vm7, %v508_v0, %v503_v61  ;;  %v528_v9 = vsub.s32 %v525_v60, %v869_v35  ;;  %v446_v12 = vadd.f32 0.5, %v430_v34  ;;  %v546_v13 = vadd.s32 4294967208, %v918_v52 }
 0x1ca   :  { %v403_v29 = vmul.f32 0.5, %v387_v18  ;;  %v515_v11 = vrot.slane %v444_v62, %v514_v63  ;;  %v535_v15 = vsub.s32 %v532_v1, %v869_v35  ;;  %v447_v16 = vadd.f32 0.5, %v431_v2 }
 0x1cb   :  { %v363_v14 = vpop.xlane.xlu0 %362  ;;  %v542_v18 = vsub.s32 %v539_v3, %v869_v35  ;;  %v553_v22 = vadd.s32 4294967200, %v918_v52  ;;  %v560_v25 = vadd.s32 4294967192, %v918_v52  ;;  %v529_v28 = vrot.slane %v446_v12, %v528_v9 }
 0x1cc   :  { %v389_v17 = vadd.f32 %v909_v33, %v363_v14  ;;  %724 = vtanh.f32 %v403_v29  ;;  %v517_v20 = vsel %vm516_vm8, %v515_v11, %v510_v7  ;;  %v549_v30 = vsub.s32 %v546_v13, %v869_v35 }
 0x1cd   :  { %726 = vtanh.f32 %v404_v36  ;;  %v574_v31 = vadd.s32 4294967176, %v918_v52  ;;  %v536_v36 = vrot.slane %v447_v16, %v535_v15  ;;  %v556_v41 = vsub.s32 %v553_v22, %v869_v35 }
 0x1ce   :  { %v405_v39 = vmul.f32 0.5, %v389_v17  ;;  %v522_v17 = vrot.slane %v445_v8, %v521_v4  ;;  %v563_v44 = vsub.s32 %v560_v25, %v869_v35 }
 0x1cf   :  { %v577_v52 = vsub.s32 %v574_v31, %v869_v35 }
 0x1d0   :  { %728 = vtanh.f32 %v405_v39  ;;  %v524_v32 = vsel %vm523_vm9, %v522_v17, %v517_v20 }
 0x1d1   :  { %v531_v38 = vsel %vm530_vm10, %v529_v28, %v524_v32 }
 0x1d2   :  { %v538_v48 = vsel %vm537_vm11, %v536_v36, %v531_v38 }
 0x1dc   :  { %v351_v43 = vpop.xlane.xlu1 %350 }
 0x1dd   :  { %v385_v46 = vadd.f32 %v909_v33, %v351_v43  ;;  %v721_v33 = vpop.eup %720  ;;  %v570_v43 = vsub.s32 %v567_v24, %v869_v35 }
 0x1de   :  { %v432_v5 = vmul.f32 0.5, %v721_v33  ;;  %v723_v6 = vpop.eup %722 }
 0x1df   :  { %v401_v51 = vmul.f32 0.5, %v385_v46  ;;  %v725_v10 = vpop.eup %724  ;;  %v434_v23 = vmul.f32 0.5, %v723_v6 }
 0x1e0   :  { %v727_v14 = vpop.eup %726  ;;  %v448_v21 = vadd.f32 0.5, %v432_v5  ;;  %v435_v26 = vmul.f32 0.5, %v725_v10 }
 0x1e1   :  { %730 = vtanh.f32 %v401_v51  ;;  %v729_v19 = vpop.eup %728  ;;  %v436_v29 = vmul.f32 0.5, %v727_v14  ;;  %v450_v42 = vadd.f32 0.5, %v434_v23 }
 0x1e2   :  { %v437_v37 = vmul.f32 0.5, %v729_v19  ;;  %v543_v40 = vrot.slane %v448_v21, %v542_v18  ;;  %v451_v45 = vadd.f32 0.5, %v435_v26 }
 0x1e3   :  { %v452_v47 = vadd.f32 0.5, %v436_v29  ;;  %v557_v53 = vrot.slane %v450_v42, %v556_v41 }
 0x1e4   :  { %v453_v49 = vadd.f32 0.5, %v437_v37  ;;  %v545_v51 = vsel %vm544_vm12, %v543_v40, %v538_v48  ;;  %v564_v54 = vrot.slane %v451_v45, %v563_v44 }
 0x1e5   :  { %v571_v56 = vrot.slane %v452_v47, %v570_v43 }
 0x1e6   :  { %v578_v33 = vrot.slane %v453_v49, %v577_v52 }
 0x1eb   :  { %v731_v27 = vpop.eup %730 }
 0x1ec   :  { %v433_v39 = vmul.f32 0.5, %v731_v27 }
 0x1ee   :  { %v449_v46 = vadd.f32 0.5, %v433_v39 }
 0x1f0   :  { %v550_v50 = vrot.slane %v449_v46, %v549_v30 }
 0x1f2   :  { %v552_v55 = vsel %vm551_vm13, %v550_v50, %v545_v51 }
 0x1f3   :  { %v559_v57 = vsel %vm558_vm14, %v557_v53, %v552_v55 }
 0x1f4   :  { %v566_v58 = vsel %vm565_vm15, %v564_v54, %v559_v57 }
 0x1f5   :  { %v573_v35 = vsel %vm572_vm0, %v571_v56, %v566_v58 }
 0x1f6   :  { %v580_v59 = vsel %vm579_vm1, %v578_v33, %v573_v35 }
 0x1f7   :  { %582 = vst [vmem:[#allocation3] sm:$0x1] %v580_v59 }
 0x1f8   :  { %743 = shalt.err (!%p740_p4)
}
 0x1f9   :  { %s744_s20 = scalar_lea.hbm %s985_s5, 16 }
 0x1fa   :  { %p745_p5 = scmp.ne.s32.totalorder %s985_s5, %s744_s20  ;;  %p748_p6 = scmp.lt.u32.totalorder %s744_s20, %s985_s5 }
 0x1fc   :  { %p750_p7 = pnand %p748_p6, %p745_p5 }
 0x1fe   :  { %753 = shalt.err (!%p750_p7)
}
 0x1ff   :  { %592 = dma.vmem_to_hbm [thread:$0]  %s590_s15, 16, %s985_s5, [#allocation4]  }
 0x200   :  { %754 = dma.done.wait [#allocation4], 16  }
 0x201   :  { %755 = vsyncadd [#allocation4], 4294967280 }
 0x202   :  { %596 = vsyncpa [#allocation4], 1 }

</bundles_post_ra>
